<compile_context>
chip_gen: v7x
topology: tpu7x:2x2x1
jax: 0.10.0
libtpu: 0.0.40
codegen_flags: <defaults>
</compile_context>

<pallas_src>
import jax
import jax.numpy as jnp
from jax.experimental import pallas as pl
from jax.experimental.pallas import tpu as pltpu


# Split large copies into a few concurrent DMAs (issued back-to-back, waited
# together) along the leading axis.  Small tensors use a single whole-ref DMA.
_MAX_DMA_CHUNKS = 4
_CHUNK_THRESHOLD_BYTES = 2 * 1024 * 1024  # > 2 MiB -> use multiple DMAs


def _build_hbm_copy_kernel(chunks):
    """Kernel factory: copy x -> o entirely via HBM->HBM DMAs (no VMEM staging).

    `chunks` is a static Python list: either [None] (single whole-ref DMA) or a
    list of (start, size) slices along axis 0.
    """

    def kernel(x_ref, o_ref, sem):
        copies = []
        for i, chunk in enumerate(chunks):
            if chunk is None:
                cp = pltpu.make_async_copy(x_ref, o_ref, sem.at[i])
            else:
                start, size = chunk
                cp = pltpu.make_async_copy(
                    x_ref.at[pl.ds(start, size)],
                    o_ref.at[pl.ds(start, size)],
                    sem.at[i],
                )
            cp.start()
            copies.append(cp)
        for cp in copies:
            cp.wait()

    return kernel


def _plan_chunks(shape, itemsize):
    """Static DMA plan: [None] for one whole-ref DMA, else (start, size) blocks."""
    if len(shape) == 0:
        return [None]
    leading = shape[0]
    total_bytes = itemsize
    for d in shape:
        total_bytes *= d
    if leading < 2 or total_bytes <= _CHUNK_THRESHOLD_BYTES:
        return [None]
    nc = min(_MAX_DMA_CHUNKS, leading)
    base, rem = divmod(leading, nc)
    chunks = []
    start = 0
    for i in range(nc):
        size = base + (1 if i < rem else 0)
        chunks.append((start, size))
        start += size
    return chunks


def _pallas_hbm_copy(x: jax.Array) -> jax.Array:
    """Materialized copy of x into a new HBM buffer via direct HBM->HBM DMA."""
    if x.ndim == 0 or x.size == 0:
        # Nothing for a DMA to move; still honour the "real copy" contract.
        return jnp.copy(x)

    chunks = _plan_chunks(x.shape, x.dtype.itemsize)

    return pl.pallas_call(
        _build_hbm_copy_kernel(chunks),
        out_shape=jax.ShapeDtypeStruct(x.shape, x.dtype),
        in_specs=[pl.BlockSpec(memory_space=pl.ANY)],   # stay in HBM
        out_specs=pl.BlockSpec(memory_space=pl.ANY),    # stay in HBM
        scratch_shapes=[pltpu.SemaphoreType.DMA((len(chunks),))],
        compiler_params=pltpu.CompilerParams(has_side_effects=True),
    )(x)


def my_none_forward(x: jax.Array, *, force_pallas_copy: bool = False) -> jax.Array:
    """Pallas equivalent of myNone.forward.

    Default: pure identity -> return x (zero bytes moved), exactly matching the
    PyTorch module.  Set force_pallas_copy=True to obtain a distinct,
    materialized copy produced by large HBM->HBM DMAs inside a Pallas kernel.
    """
    if not force_pallas_copy:
        return x
    return _pallas_hbm_copy(x)


if __name__ == "__main__":
    key = jax.random.PRNGKey(0)

    # NCHW input consistent with a conv-style SpikeModule usage.
    x = jax.random.normal(key, (2, 4, 16, 16), dtype=jnp.float32)

    # 1) Default path: true identity, no kernel launched.
    out_fast = my_none_forward(x)
    jax.block_until_ready(out_fast)
    assert out_fast.shape == x.shape
    assert out_fast.dtype == x.dtype
    assert bool(jnp.all(out_fast == x))

    # 2) Forced-copy path: single whole-ref HBM->HBM DMA, verified element-wise.
    out_copy = my_none_forward(x, force_pallas_copy=True)
    jax.block_until_ready(out_copy)
    assert out_copy.shape == x.shape
    assert out_copy.dtype == x.dtype
    assert bool(jnp.all(out_copy == x))

    # 3) Odd shape (size not a multiple of 128): no silent fallback anymore —
    #    the DMA copy handles it directly.
    k2 = jax.random.fold_in(key, 1)
    x_odd = jax.random.normal(k2, (3, 5, 7), dtype=jnp.float32)
    out_odd = my_none_forward(x_odd, force_pallas_copy=True)
    jax.block_until_ready(out_odd)
    assert bool(jnp.all(out_odd == x_odd))

    # 4) Medium tensor exercises the multi-chunk DMA path (4 x ~1 MiB DMAs).
    k3 = jax.random.fold_in(key, 2)
    x_med = jax.random.normal(k3, (4, 256, 1024), dtype=jnp.float32)
    out_med = my_none_forward(x_med, force_pallas_copy=True)
    jax.block_until_ready(out_med)
    assert bool(jnp.all(out_med == x_med))

    # 5) Empty tensor: guarded fast path.
    x_empty = jnp.zeros((0, 4, 16, 16), dtype=jnp.float32)
    out_empty = my_none_forward(x_empty, force_pallas_copy=True)
    jax.block_until_ready(out_empty)
    assert out_empty.shape == x_empty.shape

    print("KERNEL_OK")
</pallas_src>

<mosaic_0001>
module attributes {stable_mosaic.version = 11 : i64} {
  func.func @kernel(%arg0: memref<2x4x16x16xf32, #tpu.memory_space<any>>, %arg1: memref<2x4x16x16xf32, #tpu.memory_space<any>>, %arg2: memref<1x!tpu.dma_semaphore, #tpu.memory_space<semaphore_mem>>) attributes {dimension_semantics = [], scalar_prefetch = 0 : i64, scratch_operands = 1 : i64, tpu.core_type = #tpu.core_type<tc>} {
    %c0_i32 = arith.constant 0 : i32
    %0 = tpu.memref_slice %arg2[%c0_i32] : memref<1x!tpu.dma_semaphore, #tpu.memory_space<semaphore_mem>> -> memref<1x!tpu.dma_semaphore, #tpu.memory_space<semaphore_mem>>
    %1 = tpu.memref_squeeze %0 : memref<1x!tpu.dma_semaphore, #tpu.memory_space<semaphore_mem>> -> memref<!tpu.dma_semaphore, #tpu.memory_space<semaphore_mem>>
    tpu.enqueue_dma source(%arg0 : memref<2x4x16x16xf32, #tpu.memory_space<any>>) target(%arg1 : memref<2x4x16x16xf32, #tpu.memory_space<any>>) target_semaphore(%1 : memref<!tpu.dma_semaphore, #tpu.memory_space<semaphore_mem>>)
    %c0_i32_0 = arith.constant 0 : i32
    %2 = tpu.memref_slice %arg2[%c0_i32_0] : memref<1x!tpu.dma_semaphore, #tpu.memory_space<semaphore_mem>> -> memref<1x!tpu.dma_semaphore, #tpu.memory_space<semaphore_mem>>
    %3 = tpu.memref_squeeze %2 : memref<1x!tpu.dma_semaphore, #tpu.memory_space<semaphore_mem>> -> memref<!tpu.dma_semaphore, #tpu.memory_space<semaphore_mem>>
    tpu.wait_dma2 semaphore(%3 : memref<!tpu.dma_semaphore, #tpu.memory_space<semaphore_mem>>) src(%arg0 : memref<2x4x16x16xf32, #tpu.memory_space<any>>) dst(%arg1 : memref<2x4x16x16xf32, #tpu.memory_space<any>>)
    return
  }
}

</mosaic_0001>

<bundles_post_ra>
// kernel: tpu_custom_call.1
= control target key start
LH: loop header
LB: loop body
LE: loop exit
PB: predicated region body
PF: predicated region fallthrough
CT: control target
= control target key end

     0   :  { %s36_s6 = smov [#allocation2]   ;;  %s37_s7 = smov [#allocation3]   ;;  %s55_s0 = inlined_call_operand.hbm [shape: f32[2,4,16,16], index: 0, kind: input, shape index: {}]   ;;  %s56_s1 = inlined_call_operand.hbm [shape: f32[2,4,16,16], index: 1, kind: output, shape index: {}]  }
   0x1   :  { %s38_s8 = smov 0  }
   0x2   :  { %18 = dma.general %s55_s0, 2048, %s56_s1, %s36_s6, %s37_s7, [#allocation4], %s38_s8, 0  }
   0x3   :  { %34 = dma.done.wait [#allocation2], 2048 }
   0x4   :  { %35 = vsyncadd [#allocation2], 4294965248 }
   0x5   :  { %24 = vsyncmov [#allocation2] }
   0x8   :  { %s25_s13 = vpop.sfrf %24 }
   0x9   :  { %p30_p0 = scmp.ne.s32.totalorder %s25_s13, 0 }
   0xb   :  { %29 = shalt.err (%p30_p0)  }

</bundles_post_ra>
